<compile_context>
chip_gen: v7x
topology: tpu7x:2x2x1
jax: 0.10.0
libtpu: 0.0.40
codegen_flags: <defaults>
</compile_context>

<pallas_src>
import jax
import jax.numpy as jnp
from jax.experimental import pallas as pl
from jax.experimental.pallas import tpu as pltpu


def critic_kernel(s_ref, a_ref, w1s_ref, w1a_ref, b1_ref, w2_ref, b2_ref,
                  wq_ref, bq_ref, out_ref):
    # fc1 with fused concat:  [s | a] @ [[W1s],[W1a]]  ==  s@W1s + a@W1a
    h1 = (jnp.dot(s_ref[...], w1s_ref[...], preferred_element_type=jnp.float32)
          + jnp.dot(a_ref[...], w1a_ref[...], preferred_element_type=jnp.float32)
          + b1_ref[...])
    h1 = jnp.maximum(h1, 0.0)                                   # relu(fc1)

    h2 = jnp.dot(h1, w2_ref[...], preferred_element_type=jnp.float32) + b2_ref[...]
    h2 = jnp.maximum(h2, 0.0)                                   # relu(fc2)

    # Final 1-output layer: VPU multiply + cross-lane reduce (avoids a 1-column MXU pass).
    q = jnp.sum(h2 * wq_ref[...], axis=-1, keepdims=True) + bq_ref[0, 0]
    out_ref[...] = q.astype(out_ref.dtype)                      # [tm, 1]


def critic_forward(state, action, params, *, tm_max=512):
    """state: [B, input_dims], action: [B, action_dims] -> q: [B, 1]"""
    w1, b1, w2, b2, wq, bq = params
    state = state.astype(jnp.float32)
    action = action.astype(jnp.float32)

    B, Ds = state.shape
    Da = action.shape[1]
    F1 = w1.shape[1]
    F2 = w2.shape[1]

    # Split fc1 weight rows so the concat never materializes.
    w1s, w1a = w1[:Ds], w1[Ds:]
    wq_row = wq.reshape(1, F2)          # [1, fc2] for the VPU reduction
    bq_s = bq.reshape(1, 1)             # scalar -> SMEM

    # Batch tiling: single full block for small B, otherwise tm_max-row tiles (+zero pad).
    tm = B if B <= tm_max else tm_max
    pad = (-B) % tm
    if pad:
        state = jnp.pad(state, ((0, pad), (0, 0)))
        action = jnp.pad(action, ((0, pad), (0, 0)))
    Bp = B + pad
    grid = (Bp // tm,)

    batch_spec = lambda feat: pl.BlockSpec((tm, feat), lambda i: (i, 0))
    resident = lambda a: pl.BlockSpec(a.shape, lambda i: (0, 0))   # weights stay VMEM-resident

    out = pl.pallas_call(
        critic_kernel,
        out_shape=jax.ShapeDtypeStruct((Bp, 1), jnp.float32),
        grid=grid,
        in_specs=[
            batch_spec(Ds),                 # state tile
            batch_spec(Da),                 # action tile
            resident(w1s), resident(w1a),   # fc1 weight (split)
            resident(b1),
            resident(w2), resident(b2),
            resident(wq_row),
            pl.BlockSpec((1, 1), lambda i: (0, 0), memory_space=pltpu.SMEM),  # bq scalar
        ],
        out_specs=pl.BlockSpec((tm, 1), lambda i: (i, 0)),
        compiler_params=pltpu.CompilerParams(dimension_semantics=("parallel",)),
    )(state, action, w1s, w1a, b1, w2, b2, wq_row, bq_s)

    return out[:B]


def init_params(key, input_dims, action_dims, fc1_dims, fc2_dims):
    """Deterministic init mimicking torch nn.Linear default (uniform +-1/sqrt(fan_in)).
    Weights stored as [in, out] (transposed vs. torch's [out, in])."""
    def linear(k, fan_in, fan_out):
        kw, kb = jax.random.split(k)
        bound = 1.0 / jnp.sqrt(fan_in)
        w = jax.random.uniform(kw, (fan_in, fan_out), jnp.float32, -bound, bound)
        b = jax.random.uniform(kb, (1, fan_out), jnp.float32, -bound, bound)
        return w, b

    k1, k2, k3 = jax.random.split(key, 3)
    w1, b1 = linear(k1, input_dims + action_dims, fc1_dims)
    w2, b2 = linear(k2, fc1_dims, fc2_dims)
    wq, bq = linear(k3, fc2_dims, 1)
    return (w1, b1, w2, b2, wq, bq)


def _reference(state, action, params):
    w1, b1, w2, b2, wq, bq = params
    x = jnp.concatenate([state, action], axis=1)
    h1 = jnp.maximum(x @ w1 + b1, 0.0)
    h2 = jnp.maximum(h1 @ w2 + b2, 0.0)
    return h2 @ wq + bq


if __name__ == "__main__":
    # Small shapes consistent with the module's forward().
    batch = 8
    input_dims = (8,)       # state feature dim
    action_dims = 4
    fc1_dims = 32
    fc2_dims = 32

    key = jax.random.PRNGKey(0)
    kp, ks, ka = jax.random.split(key, 3)

    params = init_params(kp, input_dims[0], action_dims, fc1_dims, fc2_dims)
    state = jax.random.normal(ks, (batch, input_dims[0]), jnp.float32)
    action = jax.random.normal(ka, (batch, action_dims), jnp.float32)

    q = critic_forward(state, action, params)
    q = jax.block_until_ready(q)
    q_ref = _reference(state, action, params)
    assert q.shape == (batch, 1)
    assert jnp.allclose(q, q_ref, atol=1e-5, rtol=1e-5)

    # Exercise the multi-tile grid path + batch padding (grid=3, tm=8, pad 20->24).
    big_b = 20
    state2 = jax.random.normal(jax.random.PRNGKey(1), (big_b, input_dims[0]), jnp.float32)
    action2 = jax.random.normal(jax.random.PRNGKey(2), (big_b, action_dims), jnp.float32)
    q2 = jax.block_until_ready(critic_forward(state2, action2, params, tm_max=8))
    q2_ref = _reference(state2, action2, params)
    assert q2.shape == (big_b, 1)
    assert jnp.allclose(q2, q2_ref, atol=1e-5, rtol=1e-5)

    print("KERNEL_OK")
</pallas_src>

<mosaic_0001>
module attributes {stable_mosaic.version = 11 : i64} {
  func.func @critic_kernel(%arg0: i32, %arg1: memref<8x8xf32, #tpu.memory_space<vmem>>, %arg2: memref<8x4xf32, #tpu.memory_space<vmem>>, %arg3: memref<8x32xf32, #tpu.memory_space<vmem>>, %arg4: memref<4x32xf32, #tpu.memory_space<vmem>>, %arg5: memref<1x32xf32, #tpu.memory_space<vmem>>, %arg6: memref<32x32xf32, #tpu.memory_space<vmem>>, %arg7: memref<1x32xf32, #tpu.memory_space<vmem>>, %arg8: memref<1x32xf32, #tpu.memory_space<vmem>>, %arg9: memref<1x1xf32, #tpu.memory_space<smem>>, %arg10: memref<8x1xf32, #tpu.memory_space<vmem>>) attributes {dimension_semantics = [#tpu.dimension_semantics<parallel>], iteration_bounds = array<i64: 1>, scalar_prefetch = 0 : i64, scratch_operands = 0 : i64, tpu.core_type = #tpu.core_type<tc>, window_params = [{transform_indices = @transform_0, window_bounds = array<i64: 8, 8>}, {transform_indices = @transform_1, window_bounds = array<i64: 8, 4>}, {pipeline_mode = #tpu.pipeline_mode<synchronous>, transform_indices = @transform_2, window_bounds = array<i64: 8, 32>}, {pipeline_mode = #tpu.pipeline_mode<synchronous>, transform_indices = @transform_3, window_bounds = array<i64: 4, 32>}, {pipeline_mode = #tpu.pipeline_mode<synchronous>, transform_indices = @transform_4, window_bounds = array<i64: 1, 32>}, {pipeline_mode = #tpu.pipeline_mode<synchronous>, transform_indices = @transform_5, window_bounds = array<i64: 32, 32>}, {pipeline_mode = #tpu.pipeline_mode<synchronous>, transform_indices = @transform_6, window_bounds = array<i64: 1, 32>}, {pipeline_mode = #tpu.pipeline_mode<synchronous>, transform_indices = @transform_7, window_bounds = array<i64: 1, 32>}, {transform_indices = @transform_8, window_bounds = array<i64: 1, 1>}, {transform_indices = @transform_9, window_bounds = array<i64: 8, 1>}]} {
    %c0 = arith.constant 0 : index
    %c0_0 = arith.constant 0 : index
    %0 = vector.load %arg1[%c0, %c0_0] : memref<8x8xf32, #tpu.memory_space<vmem>>, vector<8x8xf32>
    %c0_1 = arith.constant 0 : index
    %c0_2 = arith.constant 0 : index
    %1 = vector.load %arg3[%c0_1, %c0_2] : memref<8x32xf32, #tpu.memory_space<vmem>>, vector<8x32xf32>
    %cst = arith.constant dense<0.000000e+00> : vector<8x32xf32>
    %2 = tpu.matmul %0, %1, %cst {dimension_numbers = #tpu.dot_dimension_numbers<[1], [0], [0], [1], [0, 0, 1, 1], [], []>} : vector<8x8xf32>, vector<8x32xf32>, vector<8x32xf32> -> vector<8x32xf32>
    %c0_3 = arith.constant 0 : index
    %c0_4 = arith.constant 0 : index
    %3 = vector.load %arg2[%c0_3, %c0_4] : memref<8x4xf32, #tpu.memory_space<vmem>>, vector<8x4xf32>
    %c0_5 = arith.constant 0 : index
    %c0_6 = arith.constant 0 : index
    %4 = vector.load %arg4[%c0_5, %c0_6] : memref<4x32xf32, #tpu.memory_space<vmem>>, vector<4x32xf32>
    %cst_7 = arith.constant dense<0.000000e+00> : vector<8x32xf32>
    %5 = tpu.matmul %3, %4, %cst_7 {dimension_numbers = #tpu.dot_dimension_numbers<[1], [0], [0], [1], [0, 0, 1, 1], [], []>} : vector<8x4xf32>, vector<4x32xf32>, vector<8x32xf32> -> vector<8x32xf32>
    %6 = arith.addf %2, %5 : vector<8x32xf32>
    %c0_8 = arith.constant 0 : index
    %c0_9 = arith.constant 0 : index
    %7 = vector.load %arg5[%c0_8, %c0_9] : memref<1x32xf32, #tpu.memory_space<vmem>>, vector<1x32xf32>
    %8 = vector.broadcast %7 : vector<1x32xf32> to vector<8x32xf32>
    %9 = arith.addf %6, %8 : vector<8x32xf32>
    %cst_10 = arith.constant 0.000000e+00 : f32
    %10 = vector.broadcast %cst_10 : f32 to vector<8x32xf32>
    %11 = arith.maximumf %9, %10 : vector<8x32xf32>
    %c0_11 = arith.constant 0 : index
    %c0_12 = arith.constant 0 : index
    %12 = vector.load %arg6[%c0_11, %c0_12] : memref<32x32xf32, #tpu.memory_space<vmem>>, vector<32x32xf32>
    %cst_13 = arith.constant dense<0.000000e+00> : vector<8x32xf32>
    %13 = tpu.matmul %11, %12, %cst_13 {dimension_numbers = #tpu.dot_dimension_numbers<[1], [0], [0], [1], [0, 0, 1, 1], [], []>} : vector<8x32xf32>, vector<32x32xf32>, vector<8x32xf32> -> vector<8x32xf32>
    %c0_14 = arith.constant 0 : index
    %c0_15 = arith.constant 0 : index
    %14 = vector.load %arg7[%c0_14, %c0_15] : memref<1x32xf32, #tpu.memory_space<vmem>>, vector<1x32xf32>
    %15 = vector.broadcast %14 : vector<1x32xf32> to vector<8x32xf32>
    %16 = arith.addf %13, %15 : vector<8x32xf32>
    %cst_16 = arith.constant 0.000000e+00 : f32
    %17 = vector.broadcast %cst_16 : f32 to vector<8x32xf32>
    %18 = arith.maximumf %16, %17 : vector<8x32xf32>
    %c0_17 = arith.constant 0 : index
    %c0_18 = arith.constant 0 : index
    %19 = vector.load %arg8[%c0_17, %c0_18] : memref<1x32xf32, #tpu.memory_space<vmem>>, vector<1x32xf32>
    %20 = vector.broadcast %19 : vector<1x32xf32> to vector<8x32xf32>
    %21 = arith.mulf %18, %20 : vector<8x32xf32>
    %cst_19 = arith.constant dense<0.000000e+00> : vector<8xf32>
    %22 = vector.multi_reduction <add>, %21, %cst_19 [1] : vector<8x32xf32> to vector<8xf32>
    %23 = vector.shape_cast %22 : vector<8xf32> to vector<8x1xf32>
    %c0_20 = arith.constant 0 : index
    %c0_21 = arith.constant 0 : index
    %24 = memref.load %arg9[%c0_20, %c0_21] : memref<1x1xf32, #tpu.memory_space<smem>>
    %25 = vector.broadcast %24 : f32 to vector<8x1xf32>
    %26 = arith.addf %23, %25 : vector<8x1xf32>
    %c0_22 = arith.constant 0 : index
    %c0_23 = arith.constant 0 : index
    %27 = vector.load %arg10[%c0_22, %c0_23] : memref<8x1xf32, #tpu.memory_space<vmem>>, vector<8x1xf32>
    tpu.vector_store %arg10[%c0_22, %c0_23], %26 {strides = array<i32>} : memref<8x1xf32, #tpu.memory_space<vmem>>, vector<8x1xf32>,
    return
  }
  func.func @transform_0(%arg0: i32) -> (i32, i32) {
    %c0_i32 = arith.constant 0 : i32
    %c0_i32_0 = arith.constant 0 : i32
    return %arg0, %c0_i32 : i32, i32
  }
  func.func @transform_1(%arg0: i32) -> (i32, i32) {
    %c0_i32 = arith.constant 0 : i32
    %c0_i32_0 = arith.constant 0 : i32
    return %arg0, %c0_i32 : i32, i32
  }
  func.func @transform_2(%arg0: i32) -> (i32, i32) {
    %c0_i32 = arith.constant 0 : i32
    %c0_i32_0 = arith.constant 0 : i32
    %c0_i32_1 = arith.constant 0 : i32
    return %c0_i32, %c0_i32_0 : i32, i32
  }
  func.func @transform_3(%arg0: i32) -> (i32, i32) {
    %c0_i32 = arith.constant 0 : i32
    %c0_i32_0 = arith.constant 0 : i32
    %c0_i32_1 = arith.constant 0 : i32
    return %c0_i32, %c0_i32_0 : i32, i32
  }
  func.func @transform_4(%arg0: i32) -> (i32, i32) {
    %c0_i32 = arith.constant 0 : i32
    %c0_i32_0 = arith.constant 0 : i32
    %c0_i32_1 = arith.constant 0 : i32
    return %c0_i32, %c0_i32_0 : i32, i32
  }
  func.func @transform_5(%arg0: i32) -> (i32, i32) {
    %c0_i32 = arith.constant 0 : i32
    %c0_i32_0 = arith.constant 0 : i32
    %c0_i32_1 = arith.constant 0 : i32
    return %c0_i32, %c0_i32_0 : i32, i32
  }
  func.func @transform_6(%arg0: i32) -> (i32, i32) {
    %c0_i32 = arith.constant 0 : i32
    %c0_i32_0 = arith.constant 0 : i32
    %c0_i32_1 = arith.constant 0 : i32
    return %c0_i32, %c0_i32_0 : i32, i32
  }
  func.func @transform_7(%arg0: i32) -> (i32, i32) {
    %c0_i32 = arith.constant 0 : i32
    %c0_i32_0 = arith.constant 0 : i32
    %c0_i32_1 = arith.constant 0 : i32
    return %c0_i32, %c0_i32_0 : i32, i32
  }
  func.func @transform_8(%arg0: i32) -> (i32, i32) {
    %c0_i32 = arith.constant 0 : i32
    %c0_i32_0 = arith.constant 0 : i32
    %c0_i32_1 = arith.constant 0 : i32
    return %c0_i32, %c0_i32_0 : i32, i32
  }
  func.func @transform_9(%arg0: i32) -> (i32, i32) {
    %c0_i32 = arith.constant 0 : i32
    %c0_i32_0 = arith.constant 0 : i32
    return %arg0, %c0_i32 : i32, i32
  }
}

</mosaic_0001>

<bundles_post_ra>
// kernel: tpu_custom_call.1
= control target key start
LH: loop header
LB: loop body
LE: loop exit
PB: predicated region body
PF: predicated region fallthrough
CT: control target
= control target key end

     0   :  { %15 = vsyncpa [#allocation4], 0  ;;  %s582_s0 = inlined_call_operand.hbm [shape: f32[8,8], index: 0, kind: input, shape index: {}]   ;;  %s583_s1 = inlined_call_operand.vmem [shape: f32[8,4], index: 1, kind: input, shape index: {}]   ;;  %s584_s2 = inlined_call_operand.hbm [shape: f32[8,32], index: 2, kind: input, shape index: {}]   ;;  %s585_s3 = inlined_call_operand.hbm [shape: f32[4,32], index: 3, kind: input, shape index: {}]   ;;  %s586_s4 = inlined_call_operand.vmem [shape: f32[1,32], index: 4, kind: input, shape index: {}]   ;;  %s587_s5 = inlined_call_operand.vmem [shape: f32[32,32], index: 5, kind: input, shape index: {}]   ;;  %s588_s6 = inlined_call_operand.vmem [shape: f32[1,32], index: 6, kind: input, shape index: {}]   ;;  %s589_s7 = inlined_call_operand.vmem [shape: f32[1,32], index: 7, kind: input, shape index: {}]   ;;  %s590_s8 = inlined_call_operand.<no memory space> [shape: f32[1,1], index: 8, kind: input, shape index: {}]   ;;  %s591_s9 = inlined_call_operand.vmem [shape: f32[8,1], index: 9, kind: output, shape index: {}]  }
   0x1   :  { %16 = vsyncpa [#allocation6], 0  ;;  %s460_s30 = smov [#allocation5]   ;;  %s461_s11 = smov [#allocation3]  }
   0x2   :  { %s35_s10 = sshll.u32 %s460_s30, 4  ;;  %s23_s12 = sshll.u32 %s461_s11, 4  ;;  %s36_s10 = int_to_ptr.vmem [resolvable:$true] %s35_s10  ;;  %s24_s12 = int_to_ptr.vmem [resolvable:$true] %s23_s12 }
   0x3   :  { %s390_s15 = scalar_lea.hbm %s584_s2, 128 }
   0x4   :  { %p391_p0 = scmp.ne.s32.totalorder %s584_s2, %s390_s15  ;;  %p394_p1 = scmp.lt.u32.totalorder %s390_s15, %s584_s2 }
   0x6   :  { %p396_p2 = pnand %p394_p1, %p391_p0 }
   0x8   :  { %399 = shalt.err (!%p396_p2)
}
   0x9   :  { %s400_s20 = scalar_lea.vmem %s36_s10, 128  ;;  %p405_p4 = scmp.lt.s32.totalorder %s36_s10, %s36_s10 }
   0xa   :  { %p401_p3 = scmp.ne.s32.totalorder %s36_s10, %s400_s20  ;;  %p406_p5 = scmp.lt.s32.totalorder %s400_s20, %s400_s20 }
   0xc   :  { %p407_p6 = por %p406_p5, %p405_p4 }
   0xe   :  { %p408_p7 = pnand %p407_p6, %p401_p3 }
  0x10   :  { %411 = shalt.err (!%p408_p7)
}
  0x11   :  { %38 = dma.hbm_to_vmem [thread:$0]  %s584_s2, 128, %s36_s10, [#allocation6]  }
  0x12   :  { %s412_s25 = scalar_lea.hbm %s582_s0, 128 }
  0x13   :  { %p413_p8 = scmp.ne.s32.totalorder %s582_s0, %s412_s25  ;;  %p416_p9 = scmp.lt.u32.totalorder %s412_s25, %s582_s0 }
  0x15   :  { %p418_p10 = pnand %p416_p9, %p413_p8 }
  0x17   :  { %421 = shalt.err (!%p418_p10)
}
  0x18   :  { %s422_s30 = scalar_lea.vmem %s24_s12, 128  ;;  %p427_p12 = scmp.lt.s32.totalorder %s24_s12, %s24_s12 }
  0x19   :  { %p423_p11 = scmp.ne.s32.totalorder %s24_s12, %s422_s30  ;;  %p428_p13 = scmp.lt.s32.totalorder %s422_s30, %s422_s30 }
  0x1b   :  { %p429_p0 = por %p428_p13, %p427_p12 }
  0x1d   :  { %p430_p1 = pnand %p429_p0, %p423_p11 }
  0x1f   :  { %433 = shalt.err (!%p430_p1)
}
  0x20   :  { %26 = dma.hbm_to_vmem [thread:$0]  %s582_s0, 128, %s24_s12, [#allocation4]  }
  0x21   :  { %s462_s11 = smov [#allocation7]   ;;  %s434_s16 = scalar_lea.hbm %s585_s3, 64 }
  0x22   :  { %s45_s13 = sshll.u32 %s462_s11, 4  ;;  %p435_p2 = scmp.ne.s32.totalorder %s585_s3, %s434_s16  ;;  %s46_s13 = int_to_ptr.vmem [resolvable:$true] %s45_s13 }
  0x23   :  { %p438_p3 = scmp.lt.u32.totalorder %s434_s16, %s585_s3 }
  0x25   :  { %p440_p4 = pnand %p438_p3, %p435_p2 }
  0x27   :  { %443 = shalt.err (!%p440_p4)
}
  0x28   :  { %s444_s21 = scalar_lea.vmem %s46_s13, 64  ;;  %p449_p6 = scmp.lt.s32.totalorder %s46_s13, %s46_s13 }
  0x29   :  { %p445_p5 = scmp.ne.s32.totalorder %s46_s13, %s444_s21  ;;  %p450_p7 = scmp.lt.s32.totalorder %s444_s21, %s444_s21 }
  0x2b   :  { %p451_p8 = por %p450_p7, %p449_p6 }
  0x2d   :  { %p452_p9 = pnand %p451_p8, %p445_p5 }
  0x2f   :  { %455 = shalt.err (!%p452_p9)
}
  0x30   :  { %48 = dma.hbm_to_vmem [thread:$0]  %s585_s3, 64, %s46_s13, [#allocation6]  }
  0x31   :  { %456 = dma.done.wait [#allocation4], 128  }
  0x32   :  { %457 = vsyncadd [#allocation4], 4294967168 }
  0x33   :  { %458 = dma.done.wait [#allocation6], 192  }
  0x34   :  { %459 = vsyncadd [#allocation6], 4294967104  ;;  %v463_v0 = vmov 0.0   ;;  %vm464_vm0 = vmmov 0   ;;  %vm76_vm1 = vcmask 1043456   ;;  %vm72_vm2 = vcmask 31744  }
  0x35   :  { %357 = vmatprep.subr.mxu1 %v463_v0  ;;  %359 = vmatprep.mubr.msk.f32.mxu1 %vm464_vm0, %v463_v0  ;;  %v71_v1 = vld [vmem:[#allocation7] sm:$0xf]  ;;  %v70_v2 = vld [vmem:[%s583_s1] sm:$0xff]  ;;  %v69_v3 = vld [vmem:[#allocation5] sm:$0xff]  ;;  %vm150_vm3 = vcmask 64512   ;;  %v465_v7 = vmov 0.0|0.0   ;;  %v331_v28 = vstv %s590_s8 }
  0x36   :  { %375 = vmatprep.mubr.msk.f32.mxu0 %vm464_vm0, %v463_v0  ;;  %358 = vmatpush3.msk.msra.mxu1 %vm76_vm1, %v71_v1  ;;  %v68_v4 = vld [vmem:[#allocation3] sm:$0xff]  ;;  %v234_v6 = vld [vmem:[%s587_s5 + $0x8] sm:$0xff]  ;;  %v235_v9 = vld [vmem:[%s587_s5 + $0x10] sm:$0xff]  ;;  %vm244_vm4 = vcmask 261120   ;;  %vm333_vm5 = vcmask 7168  }
  0x37   :  { %360 = vmatmul.mubr.msk.f32.vlgmr.msra.gmra.mrb[0].mxu1 %vm72_vm2, %v70_v2  ;;  %362 = vmatprep.subr.mxu1 %v463_v0  ;;  %v233_v5 = vld [vmem:[%s587_s5] sm:$0xff]  ;;  %v236_v10 = vld [vmem:[%s587_s5 + $0x18] sm:$0xff] }
  0x38   :  { %363 = vmatpush3.msra.mxu1 %v69_v3  ;;  %364 = vmatprep.mubr.msk.f32.mxu1 %vm464_vm0, %v463_v0  ;;  %v379_v8 = vpack.c.bf16 %v234_v6, %v233_v5  ;;  %v382_v11 = vpack.c.bf16 %v236_v10, %v235_v9  ;;  %v344_v15 = vld [vmem:[%s586_s4] ss:$0 sm:$0xff] }
  0x39   :  { %378 = vmatprep.subr.bf16.mxu0 %v465_v7  ;;  %v345_v20 = vld [vmem:[%s588_s6] ss:$0 sm:$0xff] }
  0x3a   :  { %380 = vmatpush3.bf16.msra.mxu0 %v379_v8  ;;  %v347_v24 = vld [vmem:[%s589_s7] ss:$0 sm:$0xff] }
  0x3b   :  { %365 = vmatmul.mubr.msk.f32.vlgmr.msra.gmra.mrb[2].mxu1 %vm150_vm3, %v68_v4  ;;  %381 = vmatprep.subr.bf16.mxu0 %v465_v7 }
  0x3e   :  { %383 = vmatpush3.bf16.msra.mxu0 %v382_v11 }
 0x10a   :  { %v146_v12 = vpop.f32.mrb[0].mxu1 }
 0x10b   :  { %v361_v13 = vpop.f32.mrb[1].mxu1 }
 0x10e   :  { %v220_v14 = vpop.f32.mrb[2].mxu1 }
 0x10f   :  { %v221_v16 = vadd.f32 %v220_v14, %v146_v12  ;;  %v366_v17 = vpop.f32.mrb[3].mxu1 }
 0x111   :  { %v231_v18 = vadd.f32 %v344_v15, %v221_v16 }
 0x113   :  { %v232_v19 = vmax.f32 %v231_v18, 0.0 }
 0x115   :  { %376 = vmatmul.mubr.msk.f32.vlgmr.msra.gmra.mrb[0].mxu0 %vm244_vm4, %v232_v19 }
 0x1e8   :  { %v314_v21 = vpop.f32.mrb[0].mxu0 }
 0x1e9   :  { %v315_v22 = vadd.f32 %v345_v20, %v314_v21  ;;  %v377_v23 = vpop.f32.mrb[1].mxu0 }
 0x1eb   :  { %v318_v25 = vmax.f32 %v315_v22, 0.0 }
 0x1ed   :  { %v326_v26 = vmul.f32 %v347_v24, %v318_v25 }
 0x1ef   :  { %v327_v27 = vsel %vm244_vm4, %v326_v26, 0.0 }
 0x1f0   :  { %328 = vadd.xlane.f32.xlu0 %v327_v27 }
 0x27d   :  { %v329_v29 = vpop.xlane.xlu0 %328 }
 0x27e   :  { %v332_v30 = vadd.f32 %v331_v28, %v329_v29 }
 0x280   :  { %334 = vst.msk [vmem:[%s591_s9] sm:$0xff] %vm333_vm5, %v332_v30 }
 0x281   :  { %339 = vsyncpa [#allocation4], 1 }
 0x282   :  { %340 = vsyncpa [#allocation6], 1 }

</bundles_post_ra>
